<compile_context>
chip_gen: v7x
topology: tpu7x:2x2x1
jax: 0.10.0
libtpu: 0.0.40
codegen_flags: <defaults>
</compile_context>

<pallas_src>
import jax
import jax.numpy as jnp
import numpy as np
from jax.experimental import pallas as pl
from jax.experimental.pallas import tpu as pltpu

BIGN = 5.0   # matches the registered buffer torch.tensor([5.0])


# ----------------------------- Pallas kernel ------------------------------

def _pool_objects_kernel(x_ref, o_ref):
    """x_ref: (TM, H*W) rows of flattened spatial maps; o_ref: (TM, 1).

    Computes (max_{H,W}(x) * 2 - 1) * BIGN  ==  max(x) * (2*BIGN) - BIGN (folded).
    """
    m = jnp.max(x_ref[...], axis=-1, keepdims=True)     # lane-axis reduction (XLU)
    o_ref[...] = m * (2.0 * BIGN) - BIGN                 # constants folded at trace time


# ------------------------------- JAX wrapper --------------------------------

def pool_objects(objects):
    """objects: (..., H, W) float array. Returns (...,) per-map pooled values."""
    lead = objects.shape[:-2]
    H, W = objects.shape[-2:]
    M = 1
    for d in lead:
        M *= int(d)
    HW = H * W
    x2 = objects.reshape(M, HW)                          # contiguous reshape (no copy), lane-dense

    if M % 8 == 0 and HW % 128 == 0:
        # Gridded path: tile rows, keep the full reduction axis resident per tile (~4 MiB/tile).
        itemsize = jnp.dtype(x2.dtype).itemsize
        max_rows = max(8, ((4 << 20) // max(HW * itemsize, 1)) // 8 * 8)
        tm = min(M, max_rows)
        out = pl.pallas_call(
            _pool_objects_kernel,
            out_shape=jax.ShapeDtypeStruct((M, 1), x2.dtype),
            grid=(pl.cdiv(M, tm),),
            in_specs=[pl.BlockSpec((tm, HW), lambda i: (i, 0))],
            out_specs=pl.BlockSpec((tm, 1), lambda i: (i, 0)),
            compiler_params=pltpu.CompilerParams(dimension_semantics=("parallel",)),
        )(x2)
    else:
        # Small / irregular shapes: whole array easily fits VMEM, no grid needed.
        out = pl.pallas_call(
            _pool_objects_kernel,
            out_shape=jax.ShapeDtypeStruct((M, 1), x2.dtype),
            in_specs=[pl.BlockSpec(memory_space=pltpu.MemorySpace.VMEM)],
            out_specs=pl.BlockSpec(memory_space=pltpu.MemorySpace.VMEM),
        )(x2)
    return out.reshape(lead)


# ----------------------------- pure-JAX reference ----------------------------

def reference(objects):
    m = jnp.max(jnp.max(objects, axis=-1), axis=-1)
    return (m * 2.0 - 1.0) * BIGN


# ---------------------------------- main -------------------------------------

if __name__ == "__main__":
    key = jax.random.PRNGKey(0)
    # (batch, num_objects, H, W) object maps, like the PyTorch forward expects.
    objects = jax.random.uniform(key, (2, 4, 16, 16), jnp.float32)

    out = jax.block_until_ready(pool_objects(objects))
    ref = jax.block_until_ready(reference(objects))

    assert out.shape == (2, 4), out.shape
    np.testing.assert_allclose(np.asarray(out), np.asarray(ref), rtol=1e-6, atol=1e-6)

    print("KERNEL_OK")
</pallas_src>

<mosaic_0001>
module attributes {stable_mosaic.version = 11 : i64} {
  func.func @_pool_objects_kernel(%arg0: i32, %arg1: memref<8x256xf32, #tpu.memory_space<vmem>>, %arg2: memref<8x1xf32, #tpu.memory_space<vmem>>) attributes {dimension_semantics = [#tpu.dimension_semantics<parallel>], iteration_bounds = array<i64: 1>, scalar_prefetch = 0 : i64, scratch_operands = 0 : i64, tpu.core_type = #tpu.core_type<tc>, window_params = [{transform_indices = @transform_0, window_bounds = array<i64: 8, 256>}, {transform_indices = @transform_1, window_bounds = array<i64: 8, 1>}]} {
    %c0 = arith.constant 0 : index
    %c0_0 = arith.constant 0 : index
    %0 = vector.load %arg1[%c0, %c0_0] : memref<8x256xf32, #tpu.memory_space<vmem>>, vector<8x256xf32>
    %cst = arith.constant dense<0xFF800000> : vector<8xf32>
    %1 = vector.multi_reduction <maximumf>, %0, %cst [1] : vector<8x256xf32> to vector<8xf32>
    %2 = vector.shape_cast %1 : vector<8xf32> to vector<8x1xf32>
    %cst_1 = arith.constant 1.000000e+01 : f32
    %3 = vector.broadcast %cst_1 : f32 to vector<8x1xf32>
    %4 = arith.mulf %2, %3 : vector<8x1xf32>
    %cst_2 = arith.constant 5.000000e+00 : f32
    %5 = vector.broadcast %cst_2 : f32 to vector<8x1xf32>
    %6 = arith.subf %4, %5 : vector<8x1xf32>
    %c0_3 = arith.constant 0 : index
    %c0_4 = arith.constant 0 : index
    %7 = vector.load %arg2[%c0_3, %c0_4] : memref<8x1xf32, #tpu.memory_space<vmem>>, vector<8x1xf32>
    tpu.vector_store %arg2[%c0_3, %c0_4], %6 {strides = array<i32>} : memref<8x1xf32, #tpu.memory_space<vmem>>, vector<8x1xf32>,
    return
  }
  func.func @transform_0(%arg0: i32) -> (i32, i32) {
    %c0_i32 = arith.constant 0 : i32
    %c0_i32_0 = arith.constant 0 : i32
    return %arg0, %c0_i32 : i32, i32
  }
  func.func @transform_1(%arg0: i32) -> (i32, i32) {
    %c0_i32 = arith.constant 0 : i32
    %c0_i32_0 = arith.constant 0 : i32
    return %arg0, %c0_i32 : i32, i32
  }
}

</mosaic_0001>

<bundles_post_ra>
// kernel: tpu_custom_call.1
= control target key start
LH: loop header
LB: loop body
LE: loop exit
PB: predicated region body
PF: predicated region fallthrough
CT: control target
= control target key end

     0   :  { %6 = vsyncpa [#allocation3], 0  ;;  %s60_s6 = smov [#allocation2]   ;;  %s86_s0 = inlined_call_operand.hbm [shape: f32[8,256], index: 0, kind: input, shape index: {}]   ;;  %s87_s1 = inlined_call_operand.vmem [shape: f32[8,1], index: 1, kind: output, shape index: {}]  }
   0x1   :  { %s13_s7 = sshll.u32 %s60_s6, 4  ;;  %s36_s10 = scalar_lea.hbm %s86_s0, 256  ;;  %s14_s7 = int_to_ptr.vmem [resolvable:$true] %s13_s7 }
   0x2   :  { %p37_p0 = scmp.ne.s32.totalorder %s86_s0, %s36_s10  ;;  %p40_p1 = scmp.lt.u32.totalorder %s36_s10, %s86_s0 }
   0x4   :  { %p42_p2 = pnand %p40_p1, %p37_p0 }
   0x6   :  { %45 = shalt.err (!%p42_p2)
}
   0x7   :  { %s46_s15 = scalar_lea.vmem %s14_s7, 256  ;;  %p51_p4 = scmp.lt.s32.totalorder %s14_s7, %s14_s7 }
   0x8   :  { %p47_p3 = scmp.ne.s32.totalorder %s14_s7, %s46_s15  ;;  %p52_p5 = scmp.lt.s32.totalorder %s46_s15, %s46_s15 }
   0xa   :  { %p53_p6 = por %p52_p5, %p51_p4 }
   0xc   :  { %p54_p7 = pnand %p53_p6, %p47_p3 }
   0xe   :  { %57 = shalt.err (!%p54_p7)
}
   0xf   :  { %16 = dma.hbm_to_vmem [thread:$0]  %s86_s0, 256, %s14_s7, [#allocation3]  }
  0x10   :  { %58 = dma.done.wait [#allocation3], 256  }
  0x11   :  { %59 = vsyncadd [#allocation3], 4294967040  ;;  %v20_v0 = vld [vmem:[#allocation2] sm:$0xff]  ;;  %v21_v1 = vld [vmem:[#allocation2 + $0x8] sm:$0xff]  ;;  %vm27_vm0 = vcmask 7168  }
  0x12   :  { %v22_v2 = vmax.f32 %v20_v0, %v21_v1 }
  0x14   :  { %23 = vmax.xlane.f32.xlu0 %v22_v2 }
  0xa1   :  { %v24_v3 = vpop.xlane.xlu0 %23 }
  0xa2   :  { %v25_v4 = vmul.f32 10.0, %v24_v3 }
  0xa4   :  { %v34_v5 = vadd.f32 -5.0, %v25_v4 }
  0xa6   :  { %28 = vst.msk [vmem:[%s87_s1] sm:$0xff] %vm27_vm0, %v34_v5 }
  0xa7   :  { %33 = vsyncpa [#allocation3], 1 }

</bundles_post_ra>
